<compile_context>
chip_gen: v5e
topology: v5e:2x2
jax: 0.10.0
libtpu: 0.0.40
codegen_flags: <defaults>
</compile_context>

<pallas_src>
import functools

import jax
import jax.numpy as jnp
from jax.experimental import pallas as pl
from jax.experimental.pallas import tpu as pltpu


def _attn_dropout_kernel(q_ref, kt_ref, v_ref, u_ref, o_ref, *,
                         dropout_p, inv_scale_factor):
    q = q_ref[...]     # (B, Lq, D)  float32
    kt = kt_ref[...]   # (B, D, Lk)  float32 (pre-transposed key)
    v = v_ref[...]     # (B, Lk, Dv) float32

    # qk = q @ k^T  (NN-form batched matmul thanks to wrapper-side transpose)
    qk = jnp.einsum('bqd,bdk->bqk', q, kt,
                    preferred_element_type=jnp.float32)      # (B, Lq, Lk)

    scaled = qk * jnp.float32(1.0 / inv_scale_factor)

    # softmax over the last dim
    m = jnp.max(scaled, axis=-1, keepdims=True)
    e = jnp.exp(scaled - m)
    p = e / jnp.sum(e, axis=-1, keepdims=True)

    # dropout (training=True, inverted scaling); mask drawn once in the wrapper
    if dropout_p > 0.0:
        keep = u_ref[...] >= jnp.float32(dropout_p)
        p = jnp.where(keep, p * jnp.float32(1.0 / (1.0 - dropout_p)),
                      jnp.float32(0.0))

    # output = dropout_qk @ v
    o_ref[...] = jnp.einsum('bqk,bkd->bqd', p, v,
                            preferred_element_type=jnp.float32
                            ).astype(o_ref.dtype)


def sdpa_dropout(query, key, value, seed=0,
                 dropout_p=0.5, inv_scale_factor=1.4142135623730951):
    B, Lq, D = query.shape
    _, Lk, _ = key.shape
    Dv = value.shape[-1]

    # Pre-transpose K in the wrapper (fuses with the producer in XLA).
    key_t = jnp.swapaxes(key, 1, 2)                       # (B, D, Lk)

    # One PRNG draw for the whole dropout mask, outside the kernel.
    rand_u = jax.random.uniform(jax.random.PRNGKey(seed), (B, Lq, Lk),
                                dtype=jnp.float32)

    kernel = functools.partial(
        _attn_dropout_kernel,
        dropout_p=float(dropout_p),
        inv_scale_factor=float(inv_scale_factor),
    )

    return pl.pallas_call(
        kernel,
        out_shape=jax.ShapeDtypeStruct((B, Lq, Dv), jnp.float32),
        grid=(1,),
        in_specs=[
            pl.BlockSpec((B, Lq, D),  lambda i: (0, 0, 0)),
            pl.BlockSpec((B, D, Lk),  lambda i: (0, 0, 0)),
            pl.BlockSpec((B, Lk, Dv), lambda i: (0, 0, 0)),
            pl.BlockSpec((B, Lq, Lk), lambda i: (0, 0, 0)),
        ],
        out_specs=pl.BlockSpec((B, Lq, Dv), lambda i: (0, 0, 0)),
        compiler_params=pltpu.CompilerParams(
            dimension_semantics=("arbitrary",)),
    )(query, key_t, value, rand_u)


if __name__ == "__main__":
    rng = jax.random.PRNGKey(0)
    kq, kk, kv = jax.random.split(rng, 3)

    # shapes match the reference PyTorch script
    query = jax.random.normal(kq, (3, 16, 256), dtype=jnp.float32)
    key   = jax.random.normal(kk, (3, 32, 256), dtype=jnp.float32)
    value = jax.random.normal(kv, (3, 32, 128), dtype=jnp.float32)

    out = sdpa_dropout(query, key, value, seed=0)
    jax.block_until_ready(out)

    assert out.shape == (3, 16, 128)
    assert out.dtype == jnp.float32
    assert bool(jnp.all(jnp.isfinite(out)))
    print("KERNEL_OK")
</pallas_src>

<mosaic_0001>
module attributes {stable_mosaic.version = 11 : i64} {
  func.func @_attn_dropout_kernel(%arg0: i32, %arg1: memref<3x16x256xf32, #tpu.memory_space<vmem>>, %arg2: memref<3x256x32xf32, #tpu.memory_space<vmem>>, %arg3: memref<3x32x128xf32, #tpu.memory_space<vmem>>, %arg4: memref<3x16x32xf32, #tpu.memory_space<vmem>>, %arg5: memref<3x16x128xf32, #tpu.memory_space<vmem>>) attributes {dimension_semantics = [#tpu.dimension_semantics<arbitrary>], iteration_bounds = array<i64: 1>, scalar_prefetch = 0 : i64, scratch_operands = 0 : i64, tpu.core_type = #tpu.core_type<tc>, window_params = [{pipeline_mode = #tpu.pipeline_mode<synchronous>, transform_indices = @transform_0, window_bounds = array<i64: 3, 16, 256>}, {pipeline_mode = #tpu.pipeline_mode<synchronous>, transform_indices = @transform_1, window_bounds = array<i64: 3, 256, 32>}, {pipeline_mode = #tpu.pipeline_mode<synchronous>, transform_indices = @transform_2, window_bounds = array<i64: 3, 32, 128>}, {pipeline_mode = #tpu.pipeline_mode<synchronous>, transform_indices = @transform_3, window_bounds = array<i64: 3, 16, 32>}, {pipeline_mode = #tpu.pipeline_mode<synchronous>, transform_indices = @transform_4, window_bounds = array<i64: 3, 16, 128>}]} {
    %c0 = arith.constant 0 : index
    %c0_0 = arith.constant 0 : index
    %c0_1 = arith.constant 0 : index
    %0 = vector.load %arg1[%c0, %c0_0, %c0_1] : memref<3x16x256xf32, #tpu.memory_space<vmem>>, vector<3x16x256xf32>
    %c0_2 = arith.constant 0 : index
    %c0_3 = arith.constant 0 : index
    %c0_4 = arith.constant 0 : index
    %1 = vector.load %arg2[%c0_2, %c0_3, %c0_4] : memref<3x256x32xf32, #tpu.memory_space<vmem>>, vector<3x256x32xf32>
    %c0_5 = arith.constant 0 : index
    %c0_6 = arith.constant 0 : index
    %c0_7 = arith.constant 0 : index
    %2 = vector.load %arg3[%c0_5, %c0_6, %c0_7] : memref<3x32x128xf32, #tpu.memory_space<vmem>>, vector<3x32x128xf32>
    "tpu.trace_start"() <{level = 10 : i32, message = "bqd,bdk->bqk"}> : () -> ()
    %cst = arith.constant dense<0.000000e+00> : vector<3x16x32xf32>
    %3 = tpu.matmul %0, %1, %cst {dimension_numbers = #tpu.dot_dimension_numbers<[2], [1], [1], [2], [0, 0, 0, 1, 1, 2], [0], [0]>} : vector<3x16x256xf32>, vector<3x256x32xf32>, vector<3x16x32xf32> -> vector<3x16x32xf32>
    "tpu.trace_stop"() : () -> ()
    %cst_8 = arith.constant 0.707106769 : f32
    %4 = vector.broadcast %cst_8 : f32 to vector<3x16x32xf32>
    %5 = arith.mulf %3, %4 : vector<3x16x32xf32>
    %cst_9 = arith.constant dense<0xFF800000> : vector<3x16xf32>
    %6 = vector.multi_reduction <maximumf>, %5, %cst_9 [2] : vector<3x16x32xf32> to vector<3x16xf32>
    %7 = vector.shape_cast %6 : vector<3x16xf32> to vector<3x16x1xf32>
    %8 = vector.broadcast %7 : vector<3x16x1xf32> to vector<3x16x32xf32>
    %9 = arith.subf %5, %8 : vector<3x16x32xf32>
    %10 = math.exp %9 : vector<3x16x32xf32>
    %cst_10 = arith.constant dense<0.000000e+00> : vector<3x16xf32>
    %11 = vector.multi_reduction <add>, %10, %cst_10 [2] : vector<3x16x32xf32> to vector<3x16xf32>
    %12 = vector.shape_cast %11 : vector<3x16xf32> to vector<3x16x1xf32>
    %13 = vector.broadcast %12 : vector<3x16x1xf32> to vector<3x16x32xf32>
    %14 = arith.divf %10, %13 : vector<3x16x32xf32>
    %c0_11 = arith.constant 0 : index
    %c0_12 = arith.constant 0 : index
    %c0_13 = arith.constant 0 : index
    %15 = vector.load %arg4[%c0_11, %c0_12, %c0_13] : memref<3x16x32xf32, #tpu.memory_space<vmem>>, vector<3x16x32xf32>
    %cst_14 = arith.constant 5.000000e-01 : f32
    %16 = vector.broadcast %cst_14 : f32 to vector<3x16x32xf32>
    %17 = arith.cmpf oge, %15, %16 : vector<3x16x32xf32>
    %cst_15 = arith.constant 2.000000e+00 : f32
    %18 = vector.broadcast %cst_15 : f32 to vector<3x16x32xf32>
    %19 = arith.mulf %14, %18 : vector<3x16x32xf32>
    %cst_16 = arith.constant 0.000000e+00 : f32
    %20 = vector.broadcast %cst_16 : f32 to vector<3x16x32xf32>
    %21 = arith.select %17, %19, %20 : vector<3x16x32xi1>, vector<3x16x32xf32>
    "tpu.trace_start"() <{level = 10 : i32, message = "bqk,bkd->bqd"}> : () -> ()
    %cst_17 = arith.constant dense<0.000000e+00> : vector<3x16x128xf32>
    %22 = tpu.matmul %21, %2, %cst_17 {dimension_numbers = #tpu.dot_dimension_numbers<[2], [1], [1], [2], [0, 0, 0, 1, 1, 2], [0], [0]>} : vector<3x16x32xf32>, vector<3x32x128xf32>, vector<3x16x128xf32> -> vector<3x16x128xf32>
    "tpu.trace_stop"() : () -> ()
    %c0_18 = arith.constant 0 : index
    %c0_19 = arith.constant 0 : index
    %c0_20 = arith.constant 0 : index
    %23 = vector.load %arg5[%c0_18, %c0_19, %c0_20] : memref<3x16x128xf32, #tpu.memory_space<vmem>>, vector<3x16x128xf32>
    tpu.vector_store %arg5[%c0_18, %c0_19, %c0_20], %22 {strides = array<i32>} : memref<3x16x128xf32, #tpu.memory_space<vmem>>, vector<3x16x128xf32>,
    return
  }
  func.func @transform_0(%arg0: i32) -> (i32, i32, i32) {
    %c0_i32 = arith.constant 0 : i32
    %c0_i32_0 = arith.constant 0 : i32
    %c0_i32_1 = arith.constant 0 : i32
    %c0_i32_2 = arith.constant 0 : i32
    return %c0_i32, %c0_i32_0, %c0_i32_1 : i32, i32, i32
  }
  func.func @transform_1(%arg0: i32) -> (i32, i32, i32) {
    %c0_i32 = arith.constant 0 : i32
    %c0_i32_0 = arith.constant 0 : i32
    %c0_i32_1 = arith.constant 0 : i32
    %c0_i32_2 = arith.constant 0 : i32
    return %c0_i32, %c0_i32_0, %c0_i32_1 : i32, i32, i32
  }
  func.func @transform_2(%arg0: i32) -> (i32, i32, i32) {
    %c0_i32 = arith.constant 0 : i32
    %c0_i32_0 = arith.constant 0 : i32
    %c0_i32_1 = arith.constant 0 : i32
    %c0_i32_2 = arith.constant 0 : i32
    return %c0_i32, %c0_i32_0, %c0_i32_1 : i32, i32, i32
  }
  func.func @transform_3(%arg0: i32) -> (i32, i32, i32) {
    %c0_i32 = arith.constant 0 : i32
    %c0_i32_0 = arith.constant 0 : i32
    %c0_i32_1 = arith.constant 0 : i32
    %c0_i32_2 = arith.constant 0 : i32
    return %c0_i32, %c0_i32_0, %c0_i32_1 : i32, i32, i32
  }
  func.func @transform_4(%arg0: i32) -> (i32, i32, i32) {
    %c0_i32 = arith.constant 0 : i32
    %c0_i32_0 = arith.constant 0 : i32
    %c0_i32_1 = arith.constant 0 : i32
    %c0_i32_2 = arith.constant 0 : i32
    return %c0_i32, %c0_i32_0, %c0_i32_1 : i32, i32, i32
  }
}

</mosaic_0001>

<bundles_post_ra>
// kernel: tpu_custom_call.1
= control target key start
LH: loop header
LB: loop body
LE: loop exit
PB: predicated region body
PF: predicated region fallthrough
CT: control target
= control target key end

     0   :  { %s1079_s0 = inlined_call_operand.vmem [shape: f32[3,16,256], index: 0, kind: input, shape index: {}]   ;;  %s1080_s1 = inlined_call_operand.vmem [shape: f32[3,256,32], index: 1, kind: input, shape index: {}]   ;;  %s1081_s2 = inlined_call_operand.vmem [shape: f32[3,32,128], index: 2, kind: input, shape index: {}]   ;;  %s1082_s3 = inlined_call_operand.vmem [shape: f32[3,16,32], index: 3, kind: input, shape index: {}]   ;;  %s1083_s4 = inlined_call_operand.hbm [shape: f32[3,16,128], index: 4, kind: output, shape index: {}]  }
   0x1   :  { %v45_v0 = vld [vmem:[%s1080_s1 + $0x78] sm:$0xff]  ;;  %v44_v4 = vld [vmem:[%s1080_s1 + $0x70] sm:$0xff]  ;;  %v43_v8 = vld [vmem:[%s1080_s1 + $0x68] sm:$0xff] }
   0x2   :  { %v61_v1 = vld [vmem:[%s1080_s1 + $0xf8] sm:$0xff]  ;;  %138 = vmatpush.msra.mxu0 %v45_v0  ;;  %v60_v5 = vld [vmem:[%s1080_s1 + $0xf0] sm:$0xff]  ;;  %v59_v9 = vld [vmem:[%s1080_s1 + $0xe8] sm:$0xff] }
   0x3   :  { %v77_v2 = vld [vmem:[%s1080_s1 + $0x178] sm:$0xff]  ;;  %161 = vmatpush.msra.mxu1 %v61_v1  ;;  %v76_v6 = vld [vmem:[%s1080_s1 + $0x170] sm:$0xff]  ;;  %v75_v10 = vld [vmem:[%s1080_s1 + $0x168] sm:$0xff] }
   0x4   :  { %v93_v3 = vld [vmem:[%s1080_s1 + $0x1f8] sm:$0xff]  ;;  %184 = vmatpush.msra.mxu2 %v77_v2  ;;  %v92_v7 = vld [vmem:[%s1080_s1 + $0x1f0] sm:$0xff]  ;;  %139 = vmatpush.msra.mxu0 %v44_v4  ;;  %v91_v11 = vld [vmem:[%s1080_s1 + $0x1e8] sm:$0xff] }
   0x5   :  { %207 = vmatpush.msra.mxu3 %v93_v3  ;;  %162 = vmatpush.msra.mxu1 %v60_v5  ;;  %v42_v12 = vld [vmem:[%s1080_s1 + $0x60] sm:$0xff]  ;;  %v41_v16 = vld [vmem:[%s1080_s1 + $0x58] sm:$0xff]  ;;  %v40_v20 = vld [vmem:[%s1080_s1 + $0x50] sm:$0xff] }
   0x6   :  { %185 = vmatpush.msra.mxu2 %v76_v6  ;;  %v58_v13 = vld [vmem:[%s1080_s1 + $0xe0] sm:$0xff]  ;;  %140 = vmatpush.msra.mxu0 %v43_v8  ;;  %v57_v17 = vld [vmem:[%s1080_s1 + $0xd8] sm:$0xff]  ;;  %v56_v21 = vld [vmem:[%s1080_s1 + $0xd0] sm:$0xff] }
   0x7   :  { %208 = vmatpush.msra.mxu3 %v92_v7  ;;  %163 = vmatpush.msra.mxu1 %v59_v9  ;;  %v74_v14 = vld [vmem:[%s1080_s1 + $0x160] sm:$0xff]  ;;  %v73_v18 = vld [vmem:[%s1080_s1 + $0x158] sm:$0xff]  ;;  %v72_v22 = vld [vmem:[%s1080_s1 + $0x150] sm:$0xff] }
   0x8   :  { %v90_v15 = vld [vmem:[%s1080_s1 + $0x1e0] sm:$0xff]  ;;  %186 = vmatpush.msra.mxu2 %v75_v10  ;;  %141 = vmatpush.msra.mxu0 %v42_v12  ;;  %v89_v19 = vld [vmem:[%s1080_s1 + $0x1d8] sm:$0xff]  ;;  %v88_v23 = vld [vmem:[%s1080_s1 + $0x1d0] sm:$0xff] }
   0x9   :  { %209 = vmatpush.msra.mxu3 %v91_v11  ;;  %164 = vmatpush.msra.mxu1 %v58_v13  ;;  %v39_v24 = vld [vmem:[%s1080_s1 + $0x48] sm:$0xff]  ;;  %v38_v28 = vld [vmem:[%s1080_s1 + $0x40] sm:$0xff]  ;;  %v37_v32 = vld [vmem:[%s1080_s1 + $0x38] sm:$0xff] }
   0xa   :  { %187 = vmatpush.msra.mxu2 %v74_v14  ;;  %142 = vmatpush.msra.mxu0 %v41_v16  ;;  %v55_v25 = vld [vmem:[%s1080_s1 + $0xc8] sm:$0xff]  ;;  %v54_v29 = vld [vmem:[%s1080_s1 + $0xc0] sm:$0xff]  ;;  %v53_v33 = vld [vmem:[%s1080_s1 + $0xb8] sm:$0xff] }
   0xb   :  { %210 = vmatpush.msra.mxu3 %v90_v15  ;;  %165 = vmatpush.msra.mxu1 %v57_v17  ;;  %v71_v26 = vld [vmem:[%s1080_s1 + $0x148] sm:$0xff]  ;;  %v70_v30 = vld [vmem:[%s1080_s1 + $0x140] sm:$0xff]  ;;  %v69_v34 = vld [vmem:[%s1080_s1 + $0x138] sm:$0xff] }
   0xc   :  { %188 = vmatpush.msra.mxu2 %v73_v18  ;;  %143 = vmatpush.msra.mxu0 %v40_v20  ;;  %v87_v27 = vld [vmem:[%s1080_s1 + $0x1c8] sm:$0xff]  ;;  %v86_v31 = vld [vmem:[%s1080_s1 + $0x1c0] sm:$0xff]  ;;  %v85_v35 = vld [vmem:[%s1080_s1 + $0x1b8] sm:$0xff] }
   0xd   :  { %211 = vmatpush.msra.mxu3 %v89_v19  ;;  %166 = vmatpush.msra.mxu1 %v56_v21  ;;  %v36_v36 = vld [vmem:[%s1080_s1 + $0x30] sm:$0xff]  ;;  %v35_v40 = vld [vmem:[%s1080_s1 + $0x28] sm:$0xff]  ;;  %v34_v44 = vld [vmem:[%s1080_s1 + $0x20] sm:$0xff] }
   0xe   :  { %189 = vmatpush.msra.mxu2 %v72_v22  ;;  %144 = vmatpush.msra.mxu0 %v39_v24  ;;  %v52_v37 = vld [vmem:[%s1080_s1 + $0xb0] sm:$0xff]  ;;  %v51_v41 = vld [vmem:[%s1080_s1 + $0xa8] sm:$0xff]  ;;  %v50_v45 = vld [vmem:[%s1080_s1 + $0xa0] sm:$0xff] }
   0xf   :  { %212 = vmatpush.msra.mxu3 %v88_v23  ;;  %167 = vmatpush.msra.mxu1 %v55_v25  ;;  %v68_v38 = vld [vmem:[%s1080_s1 + $0x130] sm:$0xff]  ;;  %v67_v42 = vld [vmem:[%s1080_s1 + $0x128] sm:$0xff]  ;;  %v66_v46 = vld [vmem:[%s1080_s1 + $0x120] sm:$0xff] }
  0x10   :  { %190 = vmatpush.msra.mxu2 %v71_v26  ;;  %145 = vmatpush.msra.mxu0 %v38_v28  ;;  %v84_v39 = vld [vmem:[%s1080_s1 + $0x1b0] sm:$0xff]  ;;  %v83_v43 = vld [vmem:[%s1080_s1 + $0x1a8] sm:$0xff]  ;;  %v82_v47 = vld [vmem:[%s1080_s1 + $0x1a0] sm:$0xff] }
  0x11   :  { %213 = vmatpush.msra.mxu3 %v87_v27  ;;  %168 = vmatpush.msra.mxu1 %v54_v29  ;;  %v33_v48 = vld [vmem:[%s1080_s1 + $0x18] sm:$0xff]  ;;  %v32_v52 = vld [vmem:[%s1080_s1 + $0x10] sm:$0xff]  ;;  %v31_v56 = vld [vmem:[%s1080_s1 + $0x8] sm:$0xff] }
  0x12   :  { %191 = vmatpush.msra.mxu2 %v70_v30  ;;  %146 = vmatpush.msra.mxu0 %v37_v32  ;;  %v49_v49 = vld [vmem:[%s1080_s1 + $0x98] sm:$0xff]  ;;  %v48_v53 = vld [vmem:[%s1080_s1 + $0x90] sm:$0xff]  ;;  %v47_v57 = vld [vmem:[%s1080_s1 + $0x88] sm:$0xff] }
  0x13   :  { %214 = vmatpush.msra.mxu3 %v86_v31  ;;  %169 = vmatpush.msra.mxu1 %v53_v33  ;;  %v65_v50 = vld [vmem:[%s1080_s1 + $0x118] sm:$0xff]  ;;  %v64_v54 = vld [vmem:[%s1080_s1 + $0x110] sm:$0xff]  ;;  %v63_v58 = vld [vmem:[%s1080_s1 + $0x108] sm:$0xff] }
  0x14   :  { %192 = vmatpush.msra.mxu2 %v69_v34  ;;  %147 = vmatpush.msra.mxu0 %v36_v36  ;;  %v81_v51 = vld [vmem:[%s1080_s1 + $0x198] sm:$0xff]  ;;  %v80_v55 = vld [vmem:[%s1080_s1 + $0x190] sm:$0xff]  ;;  %v79_v59 = vld [vmem:[%s1080_s1 + $0x188] sm:$0xff] }
  0x15   :  { %215 = vmatpush.msra.mxu3 %v85_v35  ;;  %170 = vmatpush.msra.mxu1 %v52_v37  ;;  %v30_v60 = vld [vmem:[%s1080_s1] sm:$0xff]  ;;  %v19_v1 = vld [vmem:[%s1079_s0 + $0x8] sm:$0xff]  ;;  %v109_v4 = vld [vmem:[%s1080_s1 + $0x278] sm:$0xff] }
  0x16   :  { %193 = vmatpush.msra.mxu2 %v68_v38  ;;  %148 = vmatpush.msra.mxu0 %v35_v40  ;;  %v46_v61 = vld [vmem:[%s1080_s1 + $0x80] sm:$0xff]  ;;  %v23_v3 = vld [vmem:[%s1079_s0 + $0x28] sm:$0xff]  ;;  %v125_v5 = vld [vmem:[%s1080_s1 + $0x2f8] sm:$0xff] }
  0x17   :  { %216 = vmatpush.msra.mxu3 %v84_v39  ;;  %171 = vmatpush.msra.mxu1 %v51_v41  ;;  %v62_v62 = vld [vmem:[%s1080_s1 + $0x100] sm:$0xff]  ;;  %v108_v6 = vld [vmem:[%s1080_s1 + $0x270] sm:$0xff] }
  0x18   :  { %194 = vmatpush.msra.mxu2 %v67_v42  ;;  %149 = vmatpush.msra.mxu0 %v34_v44  ;;  %v78_v63 = vld [vmem:[%s1080_s1 + $0x180] sm:$0xff]  ;;  %v124_v7 = vld [vmem:[%s1080_s1 + $0x2f0] sm:$0xff] }
  0x19   :  { %217 = vmatpush.msra.mxu3 %v83_v43  ;;  %172 = vmatpush.msra.mxu1 %v50_v45  ;;  %v18_v0 = vld [vmem:[%s1079_s0] sm:$0xff] }
  0x1a   :  { %195 = vmatpush.msra.mxu2 %v66_v46  ;;  %150 = vmatpush.msra.mxu0 %v33_v48  ;;  %v22_v2 = vld [vmem:[%s1079_s0 + $0x20] sm:$0xff] }
  0x1b   :  { %218 = vmatpush.msra.mxu3 %v82_v47  ;;  %173 = vmatpush.msra.mxu1 %v49_v49 }
  0x1c   :  { %196 = vmatpush.msra.mxu2 %v65_v50  ;;  %151 = vmatpush.msra.mxu0 %v32_v52 }
  0x1d   :  { %219 = vmatpush.msra.mxu3 %v81_v51  ;;  %174 = vmatpush.msra.mxu1 %v48_v53 }
  0x1e   :  { %197 = vmatpush.msra.mxu2 %v64_v54  ;;  %152 = vmatpush.msra.mxu0 %v31_v56 }
  0x1f   :  { %220 = vmatpush.msra.mxu3 %v80_v55  ;;  %175 = vmatpush.msra.mxu1 %v47_v57 }
  0x20   :  { %198 = vmatpush.msra.mxu2 %v63_v58  ;;  %153 = vmatpush.msra.mxu0 %v30_v60 }
  0x21   :  { %221 = vmatpush.msra.mxu3 %v79_v59  ;;  %176 = vmatpush.msra.mxu1 %v46_v61 }
  0x22   :  { %199 = vmatpush.msra.mxu2 %v62_v62  ;;  %154 = vmatmul.f32.vlgmr.msra.gmra.mxu0 %v18_v0 }
  0x23   :  { %222 = vmatpush.msra.mxu3 %v78_v63  ;;  %177 = vmatmul.f32.vlgmr.msra.gmra.mxu1 %v19_v1 }
  0x24   :  { %200 = vmatmul.f32.vlgmr.msra.gmra.mxu2 %v22_v2  ;;  %223 = vmatmul.f32.vlgmr.msra.gmra.mxu3 %v23_v3 }
  0x25   :  { %230 = vmatpush.msrb.mxu0 %v109_v4  ;;  %253 = vmatpush.msrb.mxu1 %v125_v5 }
  0x26   :  { %9 = vsyncpa [#allocation3], 0  ;;  %v107_v8 = vld [vmem:[%s1080_s1 + $0x268] sm:$0xff]  ;;  %v106_v10 = vld [vmem:[%s1080_s1 + $0x260] sm:$0xff]  ;;  %vm282_vm0 = vcmask 261120   ;;  %s621_s28 = smov [#allocation2]  }
  0x27   :  { %v123_v9 = vld [vmem:[%s1080_s1 + $0x2e8] sm:$0xff]  ;;  %231 = vmatpush.msrb.mxu0 %v108_v6  ;;  %254 = vmatpush.msrb.mxu1 %v124_v7  ;;  %v122_v11 = vld [vmem:[%s1080_s1 + $0x2e0] sm:$0xff]  ;;  %v20_v12 = vld [vmem:[%s1079_s0 + $0x10] sm:$0xff]  ;;  %s550_s5 = sshll.u32 %s1083_s4, 4  ;;  %s622_s6 = smov 128   ;;  %s551_s5 = int_to_ptr.hbm [resolvable:$true] %s550_s5 }
  0x28   :  { %v21_v13 = vld [vmem:[%s1079_s0 + $0x18] sm:$0xff]  ;;  %v24_v14 = vld [vmem:[%s1079_s0 + $0x30] sm:$0xff]  ;;  %v103_v20 = vld [vmem:[%s1080_s1 + $0x248] sm:$0xff]  ;;  %s623_s7 = smov 8  }
  0x29   :  { %232 = vmatpush.msrb.mxu0 %v107_v8  ;;  %255 = vmatpush.msrb.mxu1 %v123_v9  ;;  %v25_v15 = vld [vmem:[%s1079_s0 + $0x38] sm:$0xff]  ;;  %v104_v18 = vld [vmem:[%s1080_s1 + $0x250] sm:$0xff]  ;;  %v119_v21 = vld [vmem:[%s1080_s1 + $0x2c8] sm:$0xff] }
  0x2a   :  { %v105_v16 = vld [vmem:[%s1080_s1 + $0x258] sm:$0xff]  ;;  %157 = vmatmul.f32.gmra.mxu0 %v20_v12  ;;  %v120_v19 = vld [vmem:[%s1080_s1 + $0x2d0] sm:$0xff]  ;;  %v102_v22 = vld [vmem:[%s1080_s1 + $0x240] sm:$0xff] }
  0x2b   :  { %233 = vmatpush.msrb.mxu0 %v106_v10  ;;  %256 = vmatpush.msrb.mxu1 %v122_v11  ;;  %v121_v17 = vld [vmem:[%s1080_s1 + $0x2d8] sm:$0xff]  ;;  %v118_v23 = vld [vmem:[%s1080_s1 + $0x2c0] sm:$0xff]  ;;  %v100_v26 = vld [vmem:[%s1080_s1 + $0x230] sm:$0xff] }
  0x2c   :  { %180 = vmatmul.f32.gmra.mxu1 %v21_v13  ;;  %203 = vmatmul.f32.gmra.mxu2 %v24_v14  ;;  %v101_v24 = vld [vmem:[%s1080_s1 + $0x238] sm:$0xff]  ;;  %v116_v27 = vld [vmem:[%s1080_s1 + $0x2b0] sm:$0xff]  ;;  %v99_v28 = vld [vmem:[%s1080_s1 + $0x228] sm:$0xff] }
  0x2d   :  { %226 = vmatmul.f32.gmra.mxu3 %v25_v15  ;;  %234 = vmatpush.msrb.mxu0 %v105_v16  ;;  %v117_v25 = vld [vmem:[%s1080_s1 + $0x2b8] sm:$0xff]  ;;  %v115_v29 = vld [vmem:[%s1080_s1 + $0x2a8] sm:$0xff]  ;;  %v98_v30 = vld [vmem:[%s1080_s1 + $0x220] sm:$0xff] }
  0x2e   :  { %257 = vmatpush.msrb.mxu1 %v121_v17  ;;  %v114_v31 = vld [vmem:[%s1080_s1 + $0x2a0] sm:$0xff]  ;;  %v97_v32 = vld [vmem:[%s1080_s1 + $0x218] sm:$0xff]  ;;  %v96_v34 = vld [vmem:[%s1080_s1 + $0x210] sm:$0xff] }
  0x2f   :  { %235 = vmatpush.msrb.mxu0 %v104_v18  ;;  %v113_v33 = vld [vmem:[%s1080_s1 + $0x298] sm:$0xff]  ;;  %v112_v35 = vld [vmem:[%s1080_s1 + $0x290] sm:$0xff]  ;;  %v95_v36 = vld [vmem:[%s1080_s1 + $0x208] sm:$0xff] }
  0x30   :  { %258 = vmatpush.msrb.mxu1 %v120_v19  ;;  %v111_v37 = vld [vmem:[%s1080_s1 + $0x288] sm:$0xff]  ;;  %v94_v38 = vld [vmem:[%s1080_s1 + $0x200] sm:$0xff]  ;;  %v28_v42 = vld [vmem:[%s1079_s0 + $0x50] sm:$0xff] }
  0x31   :  { %236 = vmatpush.msrb.mxu0 %v103_v20  ;;  %v110_v39 = vld [vmem:[%s1080_s1 + $0x280] sm:$0xff]  ;;  %v27_v41 = vld [vmem:[%s1079_s0 + $0x48] sm:$0xff]  ;;  %v29_v43 = vld [vmem:[%s1079_s0 + $0x58] sm:$0xff] }
  0x32   :  { %259 = vmatpush.msrb.mxu1 %v119_v21  ;;  %v26_v40 = vld [vmem:[%s1079_s0 + $0x40] sm:$0xff] }
  0x33   :  { %237 = vmatpush.msrb.mxu0 %v102_v22 }
  0x34   :  { %260 = vmatpush.msrb.mxu1 %v118_v23 }
  0x35   :  { %238 = vmatpush.msrb.mxu0 %v101_v24 }
  0x36   :  { %261 = vmatpush.msrb.mxu1 %v117_v25 }
  0x37   :  { %239 = vmatpush.msrb.mxu0 %v100_v26 }
  0x38   :  { %262 = vmatpush.msrb.mxu1 %v116_v27 }
  0x39   :  { %240 = vmatpush.msrb.mxu0 %v99_v28 }
  0x3a   :  { %263 = vmatpush.msrb.mxu1 %v115_v29 }
  0x3b   :  { %241 = vmatpush.msrb.mxu0 %v98_v30 }
  0x3c   :  { %264 = vmatpush.msrb.mxu1 %v114_v31 }
  0x3d   :  { %242 = vmatpush.msrb.mxu0 %v97_v32 }
  0x3e   :  { %265 = vmatpush.msrb.mxu1 %v113_v33 }
  0x3f   :  { %243 = vmatpush.msrb.mxu0 %v96_v34 }
  0x40   :  { %266 = vmatpush.msrb.mxu1 %v112_v35 }
  0x41   :  { %244 = vmatpush.msrb.mxu0 %v95_v36 }
  0x42   :  { %267 = vmatpush.msrb.mxu1 %v111_v37 }
  0x43   :  { %245 = vmatpush.msrb.mxu0 %v94_v38 }
  0x44   :  { %268 = vmatpush.msrb.mxu1 %v110_v39  ;;  %246 = vmatmul.f32.vlgmr.msrb.gmra.mxu0 %v26_v40  ;;  %v129_v40 = vld [vmem:[%s1081_s2 + $0x18] sm:$0xff] }
  0x45   :  { %269 = vmatmul.f32.vlgmr.msrb.gmra.mxu1 %v27_v41  ;;  %469 = vmatpush.msrb.mxu2 %v129_v40  ;;  %v128_v41 = vld [vmem:[%s1081_s2 + $0x10] sm:$0xff] }
  0x47   :  { %470 = vmatpush.msrb.mxu2 %v128_v41 }
  0x4c   :  { %249 = vmatmul.f32.gmra.mxu0 %v28_v42  ;;  %v127_v42 = vld [vmem:[%s1081_s2 + $0x8] sm:$0xff] }
  0x4d   :  { %272 = vmatmul.f32.gmra.mxu1 %v29_v43  ;;  %471 = vmatpush.msrb.mxu2 %v127_v42  ;;  %v126_v43 = vld [vmem:[%s1081_s2] sm:$0xff] }
  0x4f   :  { %472 = vmatpush.msrb.mxu2 %v126_v43 }
  0x9f   :  { %v155_v44 = vpop.f32.mrf.mxu0 }
  0xa0   :  { %v178_v45 = vpop.f32.mrf.mxu1 }
  0xa1   :  { %v179_v46 = vadd.f32 %v178_v45, %v155_v44  ;;  %v133_v44 = vld [vmem:[%s1081_s2 + $0x38] sm:$0xff]  ;;  %v132_v45 = vld [vmem:[%s1081_s2 + $0x30] sm:$0xff] }
  0xa2   :  { %498 = vmatpush.msrb.mxu3 %v133_v44 }
  0xa3   :  { %v276_v47 = vmul.f32 0.70710677, %v179_v46  ;;  %v131_v46 = vld [vmem:[%s1081_s2 + $0x28] sm:$0xff] }
  0xa4   :  { %499 = vmatpush.msrb.mxu3 %v132_v45 }
  0xa5   :  { %v283_v48 = vsel %vm282_vm0, %v276_v47, -inf }
  0xa6   :  { %284 = vmax.xlane.f32.xlu0 %v283_v48  ;;  %500 = vmatpush.msrb.mxu3 %v131_v46 }
  0xa7   :  { %v201_v49 = vpop.f32.mrf.mxu2  ;;  %v224_v50 = vpop.f32.mrf.mxu3 }
  0xa8   :  { %v225_v51 = vadd.f32 %v224_v50, %v201_v49  ;;  %v158_v52 = vpop.f32.mrf.mxu0 }
  0xa9   :  { %v181_v53 = vpop.f32.mrf.mxu1 }
  0xaa   :  { %v278_v54 = vmul.f32 0.70710677, %v225_v51  ;;  %v182_v55 = vadd.f32 %v181_v53, %v158_v52 }
  0xac   :  { %v277_v56 = vmul.f32 0.70710677, %v182_v55  ;;  %v289_v57 = vsel %vm282_vm0, %v278_v54, -inf }
  0xad   :  { %290 = vmax.xlane.f32.xlu1 %v289_v57 }
  0xae   :  { %v286_v58 = vsel %vm282_vm0, %v277_v56, -inf }
  0xaf   :  { %287 = vmax.xlane.f32.xlu0 %v286_v58  ;;  %v204_v59 = vpop.f32.mrf.mxu2 }
  0xb0   :  { %v227_v60 = vpop.f32.mrf.mxu3 }
  0xb1   :  { %v228_v61 = vadd.f32 %v227_v60, %v204_v59 }
  0xb3   :  { %v279_v62 = vmul.f32 0.70710677, %v228_v61 }
  0xb5   :  { %v292_v63 = vsel %vm282_vm0, %v279_v62, -inf }
  0xb6   :  { %293 = vmax.xlane.f32.xlu2 %v292_v63 }
  0xc1   :  { %v247_v0 = vpop.f32.mrf.mxu0 }
  0xc2   :  { %v270_v1 = vpop.f32.mrf.mxu1 }
  0xc3   :  { %v271_v2 = vadd.f32 %v270_v1, %v247_v0 }
  0xc5   :  { %v280_v3 = vmul.f32 0.70710677, %v271_v2 }
  0xc7   :  { %v295_v4 = vsel %vm282_vm0, %v280_v3, -inf }
  0xc8   :  { %296 = vmax.xlane.f32.xlu1 %v295_v4  ;;  %v137_v4 = vld [vmem:[%s1081_s2 + $0x58] sm:$0xff] }
  0xc9   :  { %v250_v5 = vpop.f32.mrf.mxu0  ;;  %527 = vmatpush.msra.mxu2 %v137_v4 }
  0xca   :  { %v273_v6 = vpop.f32.mrf.mxu1 }
  0xcb   :  { %v274_v7 = vadd.f32 %v273_v6, %v250_v5 }
  0xcd   :  { %v281_v8 = vmul.f32 0.70710677, %v274_v7 }
  0xcf   :  { %v298_v9 = vsel %vm282_vm0, %v281_v8, -inf }
  0xd0   :  { %299 = vmax.xlane.f32.xlu2 %v298_v9 }
 0x119   :  { %v285_v10 = vpop.xlane.xlu0 %284 }
 0x11a   :  { %v301_v11 = vsub.f32 %v276_v47, %v285_v10  ;;  %v130_v47 = vld [vmem:[%s1081_s2 + $0x20] sm:$0xff]  ;;  %v136_v10 = vld [vmem:[%s1081_s2 + $0x50] sm:$0xff] }
 0x11b   :  { %501 = vmatpush.msrb.mxu3 %v130_v47  ;;  %528 = vmatpush.msra.mxu2 %v136_v10 }
 0x11c   :  { %v307_v12 = vmul.f32 1.442695, %v301_v11 }
 0x11e   :  { %571 = vpow2.f32 %v307_v12 }
 0x120   :  { %v291_v13 = vpop.xlane.xlu1 %290 }
 0x121   :  { %v303_v14 = vsub.f32 %v278_v54, %v291_v13 }
 0x122   :  { %v288_v15 = vpop.xlane.xlu0 %287 }
 0x123   :  { %v311_v16 = vmul.f32 1.442695, %v303_v14  ;;  %v302_v17 = vsub.f32 %v277_v56, %v288_v15 }
 0x124   :  { %v979_v18 = vpop.eup %571 }
 0x125   :  { %573 = vpow2.f32 %v311_v16  ;;  %v309_v19 = vmul.f32 1.442695, %v302_v17  ;;  %v319_v20 = vsel %vm282_vm0, %v979_v18, 0.0  ;;  %v135_v16 = vld [vmem:[%s1081_s2 + $0x48] sm:$0xff] }
 0x126   :  { %320 = vadd.xlane.f32.xlu0 %v319_v20  ;;  %529 = vmatpush.msra.mxu2 %v135_v16  ;;  %v429_v20 = vld [vmem:[%s1082_s3 + $0x10] sm:$0xff] }
 0x127   :  { %575 = vpow2.f32 %v309_v19  ;;  %vm435_vm14 = vcmp.ge.f32.partialorder %v429_v20, 0.5 }
 0x129   :  { %v294_v21 = vpop.xlane.xlu2 %293 }
 0x12a   :  { %v304_v22 = vsub.f32 %v279_v62, %v294_v21 }
 0x12b   :  { %v983_v23 = vpop.eup %573 }
 0x12c   :  { %v313_v24 = vmul.f32 1.442695, %v304_v22  ;;  %v325_v25 = vsel %vm282_vm0, %v983_v23, 0.0  ;;  %v134_v22 = vld [vmem:[%s1081_s2 + $0x40] sm:$0xff] }
 0x12d   :  { %v987_v26 = vpop.eup %575  ;;  %326 = vadd.xlane.f32.xlu2 %v325_v25  ;;  %530 = vmatpush.msra.mxu2 %v134_v22 }
 0x12e   :  { %577 = vpow2.f32 %v313_v24  ;;  %v322_v27 = vsel %vm282_vm0, %v987_v26, 0.0 }
 0x12f   :  { %323 = vadd.xlane.f32.xlu1 %v322_v27 }
 0x134   :  { %v991_v28 = vpop.eup %577 }
 0x135   :  { %v328_v29 = vsel %vm282_vm0, %v991_v28, 0.0 }
 0x137   :  { %329 = vadd.xlane.f32.xlu1 %v328_v29 }
 0x13b   :  { %v297_v30 = vpop.xlane.xlu1 %296 }
 0x13c   :  { %v305_v31 = vsub.f32 %v280_v3, %v297_v30  ;;  %v427_v3 = vld [vmem:[%s1082_s3] sm:$0xff] }
 0x13d   :  { %vm433_vm7 = vcmp.ge.f32.partialorder %v427_v3, 0.5 }
 0x13e   :  { %v315_v32 = vmul.f32 1.442695, %v305_v31 }
 0x140   :  { %579 = vpow2.f32 %v315_v32  ;;  %v428_v32 = vld [vmem:[%s1082_s3 + $0x8] sm:$0xff] }
 0x141   :  { %vm434_vm15 = vcmp.ge.f32.partialorder %v428_v32, 0.5 }
 0x143   :  { %v300_v33 = vpop.xlane.xlu2 %299 }
 0x144   :  { %v306_v34 = vsub.f32 %v281_v8, %v300_v33 }
 0x146   :  { %v995_v35 = vpop.eup %579  ;;  %v317_v36 = vmul.f32 1.442695, %v306_v34 }
 0x147   :  { %v331_v37 = vsel %vm282_vm0, %v995_v35, 0.0 }
 0x148   :  { %581 = vpow2.f32 %v317_v36  ;;  %332 = vadd.xlane.f32.xlu0 %v331_v37 }
 0x14e   :  { %v999_v38 = vpop.eup %581 }
 0x14f   :  { %v334_v39 = vsel %vm282_vm0, %v999_v38, 0.0 }
 0x150   :  { %335 = vadd.xlane.f32.xlu2 %v334_v39 }
 0x199   :  { %v321_v48 = vpop.xlane.xlu0 %320 }
 0x19a   :  { %583 = vrcp.f32 %v321_v48  ;;  %v348_v54 = vand.u32 2147483648, %v321_v48  ;;  %v346_v56 = vand.u32 2147483647, %v321_v48  ;;  %vm342_vm2 = vweird.f32 %v321_v48 }
 0x19c   :  { %v349_v59 = vor.u32 1.1754944e-38, %v348_v54  ;;  %vm347_vm4 = vcmp.eq.f32.partialorder %v346_v56, 8.507059e+37 }
 0x1a0   :  { %v584_v49 = vpop.eup %583  ;;  %v327_v50 = vpop.xlane.xlu2 %326 }
 0x1a1   :  { %v338_v51 = vmul.f32 %v584_v49, %v321_v48  ;;  %585 = vrcp.f32 %v327_v50  ;;  %vm343_vm1 = vweird.f32 %v584_v49  ;;  %v376_v5 = vand.u32 2147483647, %v327_v50  ;;  %v430_v48 = vld [vmem:[%s1082_s3 + $0x18] sm:$0xff] }
 0x1a2   :  { %v324_v52 = vpop.xlane.xlu1 %323  ;;  %vm344_vm3 = vmor %vm342_vm2, %vm343_vm1  ;;  %v378_v6 = vand.u32 2147483648, %v327_v50  ;;  %vm372_vm6 = vweird.f32 %v327_v50 }
 0x1a3   :  { %v339_v53 = vsub.f32 1.0, %v338_v51  ;;  %587 = vrcp.f32 %v324_v52  ;;  %v363_v11 = vand.u32 2147483648, %v324_v52  ;;  %v361_v12 = vand.u32 2147483647, %v324_v52 }
 0x1a4   :  { %v379_v17 = vor.u32 1.1754944e-38, %v378_v6  ;;  %vm357_vm10 = vweird.f32 %v324_v52  ;;  %vm377_vm11 = vcmp.eq.f32.partialorder %v376_v5, 8.507059e+37 }
 0x1a5   :  { %v340_v55 = vmul.f32 %v584_v49, %v339_v53  ;;  %v364_v25 = vor.u32 1.1754944e-38, %v363_v11  ;;  %vm362_vm13 = vcmp.eq.f32.partialorder %v361_v12, 8.507059e+37  ;;  %v432_v11 = vld [vmem:[%s1082_s3 + $0x28] sm:$0xff] }
 0x1a7   :  { %v586_v57 = vpop.eup %585  ;;  %v341_v58 = vadd.f32 %v584_v49, %v340_v55 }
 0x1a8   :  { %v368_v60 = vmul.f32 %v586_v57, %v327_v50  ;;  %vm373_vm5 = vweird.f32 %v586_v57 }
 0x1a9   :  { %v588_v61 = vpop.eup %587  ;;  %v345_v62 = vsel %vm344_vm3, %v584_v49, %v341_v58  ;;  %vm374_vm9 = vmor %vm372_vm6, %vm373_vm5  ;;  %vm436_vm5 = vcmp.ge.f32.partialorder %v430_v48, 0.5 }
 0x1aa   :  { %v369_v63 = vsub.f32 1.0, %v368_v60  ;;  %v353_v0 = vmul.f32 %v588_v61, %v324_v52  ;;  %v1027_v1 = vpop.xlane.xlu1 %329  ;;  %v350_v2 = vsel %vm347_vm4, %v349_v59, %v345_v62  ;;  %vm358_vm8 = vweird.f32 %v588_v61 }
 0x1ab   :  { %589 = vrcp.f32 %v1027_v1  ;;  %v351_v9 = vmul.f32 %v979_v18, %v350_v2  ;;  %vm359_vm12 = vmor %vm357_vm10, %vm358_vm8  ;;  %v391_v39 = vand.u32 2147483647, %v1027_v1  ;;  %v393_v40 = vand.u32 2147483648, %v1027_v1 }
 0x1ac   :  { %v370_v7 = vmul.f32 %v586_v57, %v369_v63  ;;  %v354_v8 = vsub.f32 1.0, %v353_v0  ;;  %vm387_vm2 = vweird.f32 %v1027_v1  ;;  %v431_v63 = vld [vmem:[%s1082_s3 + $0x20] sm:$0xff]  ;;  %s548_s3 = sshll.u32 %s621_s28, 4  ;;  %s549_s3 = int_to_ptr.vmem [resolvable:$true] %s548_s3 }
 0x1ad   :  { %v439_v15 = vmul.f32 2.0, %v351_v9  ;;  %v394_v45 = vor.u32 1.1754944e-38, %v393_v40  ;;  %vm392_vm4 = vcmp.eq.f32.partialorder %v391_v39, 8.507059e+37  ;;  %vm437_vm10 = vcmp.ge.f32.partialorder %v431_v63, 0.5 }
 0x1ae   :  { %v371_v13 = vadd.f32 %v586_v57, %v370_v7  ;;  %v355_v14 = vmul.f32 %v588_v61, %v354_v8 }
 0x1af   :  { %v445_v18 = vsel %vm433_vm7, %v439_v15, 0.0 }
 0x1b0   :  { %v375_v19 = vsel %vm374_vm9, %v586_v57, %v371_v13  ;;  %v356_v21 = vadd.f32 %v588_v61, %v355_v14  ;;  %562 = vmatmul.msk.f32.vlgmr.msrb.gmra.mxu2 %vm282_vm0, %v445_v18 }
 0x1b1   :  { %v590_v24 = vpop.eup %589  ;;  %v380_v27 = vsel %vm377_vm11, %v379_v17, %v375_v19 }
 0x1b2   :  { %v383_v29 = vmul.f32 %v590_v24, %v1027_v1  ;;  %v381_v30 = vmul.f32 %v983_v23, %v380_v27  ;;  %v360_v31 = vsel %vm359_vm12, %v588_v61, %v356_v21  ;;  %vm388_vm1 = vweird.f32 %v590_v24 }
 0x1b3   :  { %v365_v33 = vsel %vm362_vm13, %v364_v25, %v360_v31  ;;  %vm389_vm3 = vmor %vm387_vm2, %vm388_vm1 }
 0x1b4   :  { %v384_v34 = vsub.f32 1.0, %v383_v29  ;;  %v441_v36 = vmul.f32 2.0, %v381_v30  ;;  %v366_v37 = vmul.f32 %v987_v26, %v365_v33 }
 0x1b6   :  { %v385_v41 = vmul.f32 %v590_v24, %v384_v34  ;;  %v447_v23 = vsel %vm435_vm14, %v441_v36, 0.0  ;;  %v440_v42 = vmul.f32 2.0, %v366_v37 }
 0x1b7   :  { %564 = vmatmul.msk.f32.vlgmr.msrb.gmra.mxu3 %vm282_vm0, %v447_v23 }
 0x1b8   :  { %v386_v43 = vadd.f32 %v590_v24, %v385_v41  ;;  %v446_v44 = vsel %vm434_vm15, %v440_v42, 0.0  ;;  %vm438_vm15 = vcmp.ge.f32.partialorder %v432_v11, 0.5 }
 0x1b9   :  { %563 = vmatmul.msk.f32.gmra.mxu2 %vm282_vm0, %v446_v44 }
 0x1ba   :  { %v390_v26 = vsel %vm389_vm3, %v590_v24, %v386_v43 }
 0x1bb   :  { %v333_v46 = vpop.xlane.xlu0 %332  ;;  %v395_v47 = vsel %vm392_vm4, %v394_v45, %v390_v26 }
 0x1bc   :  { %591 = vrcp.f32 %v333_v46  ;;  %v396_v49 = vmul.f32 %v991_v28, %v395_v47  ;;  %v408_v56 = vand.u32 2147483648, %v333_v46  ;;  %v406_v58 = vand.u32 2147483647, %v333_v46 }
 0x1bd   :  { %vm402_vm7 = vweird.f32 %v333_v46 }
 0x1be   :  { %v442_v50 = vmul.f32 2.0, %v396_v49  ;;  %v409_v61 = vor.u32 1.1754944e-38, %v408_v56  ;;  %vm407_vm9 = vcmp.eq.f32.partialorder %v406_v58, 8.507059e+37 }
 0x1c0   :  { %v448_v51 = vsel %vm436_vm5, %v442_v50, 0.0 }
 0x1c1   :  { %565 = vmatmul.msk.f32.gmra.mxu3 %vm282_vm0, %v448_v51 }
 0x1c2   :  { %v592_v52 = vpop.eup %591 }
 0x1c3   :  { %v398_v53 = vmul.f32 %v592_v52, %v333_v46  ;;  %v336_v54 = vpop.xlane.xlu2 %335  ;;  %vm403_vm6 = vweird.f32 %v592_v52 }
 0x1c4   :  { %593 = vrcp.f32 %v336_v54  ;;  %vm404_vm8 = vmor %vm402_vm7, %vm403_vm6  ;;  %v423_v3 = vand.u32 2147483648, %v336_v54  ;;  %v421_v5 = vand.u32 2147483647, %v336_v54  ;;  %vm417_vm12 = vweird.f32 %v336_v54 }
 0x1c5   :  { %v399_v55 = vsub.f32 1.0, %v398_v53 }
 0x1c6   :  { %v424_v9 = vor.u32 1.1754944e-38, %v423_v3  ;;  %vm422_vm14 = vcmp.eq.f32.partialorder %v421_v5, 8.507059e+37 }
 0x1c7   :  { %v400_v57 = vmul.f32 %v592_v52, %v399_v55 }
 0x1c9   :  { %v401_v59 = vadd.f32 %v592_v52, %v400_v57 }
 0x1ca   :  { %v594_v60 = vpop.eup %593 }
 0x1cb   :  { %v405_v28 = vsel %vm404_vm8, %v592_v52, %v401_v59  ;;  %v413_v62 = vmul.f32 %v594_v60, %v336_v54  ;;  %vm418_vm11 = vweird.f32 %v594_v60 }
 0x1cc   :  { %v410_v0 = vsel %vm407_vm9, %v409_v61, %v405_v28  ;;  %vm419_vm13 = vmor %vm417_vm12, %vm418_vm11 }
 0x1cd   :  { %v414_v1 = vsub.f32 1.0, %v413_v62  ;;  %v411_v2 = vmul.f32 %v995_v35, %v410_v0 }
 0x1cf   :  { %v415_v4 = vmul.f32 %v594_v60, %v414_v1  ;;  %v443_v6 = vmul.f32 2.0, %v411_v2 }
 0x1d1   :  { %v416_v7 = vadd.f32 %v594_v60, %v415_v4  ;;  %v449_v8 = vsel %vm437_vm10, %v443_v6, 0.0 }
 0x1d2   :  { %566 = vmatmul.msk.f32.vlgmr.msra.gmra.mxu2 %vm282_vm0, %v449_v8 }
 0x1d3   :  { %v420_v10 = vsel %vm419_vm13, %v594_v60, %v416_v7 }
 0x1d4   :  { %v425_v35 = vsel %vm422_vm14, %v424_v9, %v420_v10 }
 0x1d5   :  { %v426_v12 = vmul.f32 %v999_v38, %v425_v35 }
 0x1d7   :  { %v444_v13 = vmul.f32 2.0, %v426_v12 }
 0x1d9   :  { %v450_v14 = vsel %vm438_vm15, %v444_v13, 0.0 }
 0x1da   :  { %567 = vmatmul.msk.f32.gmra.mxu2 %vm282_vm0, %v450_v14 }
 0x233   :  { %v474_v15 = vpop.f32.mrf.mxu2 }
 0x234   :  { %538 = vst [vmem:[#allocation2] sm:$0xff] %v474_v15 }
 0x23a   :  { %v503_v16 = vpop.f32.mrf.mxu3 }
 0x23b   :  { %540 = vst [vmem:[#allocation2 + $0x10] sm:$0xff] %v503_v16 }
 0x23c   :  { %v477_v17 = vpop.f32.mrf.mxu2 }
 0x23d   :  { %539 = vst [vmem:[#allocation2 + $0x8] sm:$0xff] %v477_v17 }
 0x244   :  { %v506_v18 = vpop.f32.mrf.mxu3 }
 0x245   :  { %541 = vst [vmem:[#allocation2 + $0x18] sm:$0xff] %v506_v18 }
 0x255   :  { %v532_v19 = vpop.f32.mrf.mxu2 }
 0x256   :  { %542 = vst [vmem:[#allocation2 + $0x20] sm:$0xff] %v532_v19 }
 0x25d   :  { %v535_v38 = vpop.f32.mrf.mxu2 }
 0x25e   :  { %543 = vst [vmem:[#allocation2 + $0x28] sm:$0xff] %v535_v38 }
 0x25f   :  { %556 = dma.vmem_to_hbm [thread:$0]  %s549_s3, 768, %s551_s5, [#allocation3], %s622_s6, %s622_s6, %s623_s7  }
 0x260   :  { %619 = dma.done.wait [#allocation3], 768  }
 0x261   :  { %620 = vsyncadd [#allocation3], 4294966528 }
 0x262   :  { %561 = vsyncpa [#allocation3], 1 }

</bundles_post_ra>
